<compile_context>
chip_gen: v6e
topology: v6e:2x2x1
jax: 0.10.0
libtpu: 0.0.40
codegen_flags: <defaults>
</compile_context>

<pallas_src>
import functools
import math

import jax
import jax.numpy as jnp
from jax.experimental import pallas as pl
from jax.experimental.pallas import tpu as pltpu


def vocal_attention_kernel(x_ref, w_ref, b_ref, o_ref, *, batch, seq, hidden, seg):
    # x_ref: (B*S, H) flattened activations.
    # w_ref: (H, 3*seg) fused [Wq^T/sqrt(H) | Wk^T | Wv^T*mask], each segment
    #        zero-padded to `seg` (=128) lanes.
    # b_ref: (1, 3*seg) fused [bq/sqrt(H) | bk | bv*mask], zero-padded likewise.
    # o_ref: (B*S, H)
    x = x_ref[...]
    if x.dtype != jnp.float32:
        x = x.astype(jnp.float32)

    # Single fused QKV projection for all batches: 1 MXU push, 1 bias add.
    qkv = jnp.dot(x, w_ref[...], preferred_element_type=jnp.float32) + b_ref[...]
    q = qkv[:, 0:seg]                 # lane-tile-aligned slices (no relayout)
    k = qkv[:, seg:2 * seg]
    v = qkv[:, 2 * seg:3 * seg]

    # Per-batch attention (tiny B: unrolled at trace time; row slices are
    # sublane-aligned since seq is a multiple of 8 here).
    outs = []
    for bi in range(batch):
        r0 = bi * seq
        qb = q[r0:r0 + seq]                                        # (S, seg)
        kb = k[r0:r0 + seq]
        vb = v[r0:r0 + seq]

        # q @ k^T without materializing a transpose; scale already in Wq.
        scores = jax.lax.dot_general(
            qb, kb, (((1,), (1,)), ((), ())),
            preferred_element_type=jnp.float32)                    # (S, S)

        # Numerically stable softmax; reciprocal on the EUP (approx).
        m = jnp.max(scores, axis=-1, keepdims=True)
        e = jnp.exp(scores - m)
        denom = jnp.sum(e, axis=-1, keepdims=True)
        attn = e * pl.reciprocal(denom, approx=True)

        outs.append(jnp.dot(attn, vb, preferred_element_type=jnp.float32))

    # Single (B*S, H) store; pad columns of v produce zeros that we slice off.
    out = jnp.concatenate(outs, axis=0)[:, :hidden]
    if out.dtype != o_ref.dtype:
        out = out.astype(o_ref.dtype)
    o_ref[...] = out


def vocal_attention(x, wq, bq, wk, bk, wv, bv, vocal_mask):
    """x: (B, S, H); wq/wk/wv: (H, H) torch-layout (out, in); b*: (H,);
    vocal_mask: (1, 1, num_bins) with num_bins >= H (matches the module)."""
    B, S, H = x.shape
    seg = max(128, ((H + 127) // 128) * 128)     # lane-tile-aligned segment
    inv_scale = 1.0 / math.sqrt(H)

    # Wrapper-side (free XLA) prep:
    #  - slice mask to output width, fold it into the value projection
    #    ((attn @ v) * m == attn @ (v * m) since m scales columns),
    #  - fold 1/sqrt(H) into the query projection,
    #  - fuse + zero-pad each segment to `seg` lanes.
    mask_row = vocal_mask[0, 0, :H].astype(jnp.float32)            # (H,)

    def pad_w(w):      # (H, H) -> (H, seg)
        return jnp.pad(w, ((0, 0), (0, seg - H)))

    def pad_b(b):      # (H,) -> (seg,)
        return jnp.pad(b, (0, seg - H))

    w_qkv = jnp.concatenate([
        pad_w(wq.T.astype(jnp.float32) * inv_scale),
        pad_w(wk.T.astype(jnp.float32)),
        pad_w(wv.T.astype(jnp.float32) * mask_row[None, :]),
    ], axis=1)                                                     # (H, 3*seg)
    b_qkv = jnp.concatenate([
        pad_b(bq.astype(jnp.float32) * inv_scale),
        pad_b(bk.astype(jnp.float32)),
        pad_b(bv.astype(jnp.float32) * mask_row),
    ]).reshape(1, 3 * seg)                                         # (1, 3*seg)

    x2d = x.reshape(B * S, H)                                      # free reshape

    kernel = functools.partial(
        vocal_attention_kernel, batch=B, seq=S, hidden=H, seg=seg)

    out2d = pl.pallas_call(
        kernel,
        out_shape=jax.ShapeDtypeStruct((B * S, H), x.dtype),
        # grid=() single invocation: whole-array operands resident in VMEM,
        # no grid-loop scaffolding, no index maps.
        in_specs=[
            pl.BlockSpec(memory_space=pltpu.MemorySpace.VMEM),     # x (B*S, H)
            pl.BlockSpec(memory_space=pltpu.MemorySpace.VMEM),     # fused W
            pl.BlockSpec(memory_space=pltpu.MemorySpace.VMEM),     # fused b
        ],
        out_specs=pl.BlockSpec(memory_space=pltpu.MemorySpace.VMEM),
    )(x2d, w_qkv, b_qkv)

    return out2d.reshape(B, S, H)


def reference(x, wq, bq, wk, bk, wv, bv, vocal_mask):
    """Pure-JAX reference mirroring the PyTorch forward."""
    H = x.shape[-1]
    q = x @ wq.T + bq
    k = x @ wk.T + bk
    v = x @ wv.T + bv
    scores = jnp.einsum("bqh,bkh->bqk", q, k) / math.sqrt(H)
    attn = jax.nn.softmax(scores, axis=-1)
    out = jnp.einsum("bqk,bkh->bqh", attn, v)
    return out * vocal_mask[:, :, :H]


if __name__ == "__main__":
    # Small shapes consistent with the module: batch=2, seq=8, hidden=32,
    # num_bins=64 (vocal_range_bins entries < 64 get forced to 1.0).
    B, S, H, NUM_BINS = 2, 8, 32, 64

    key = jax.random.PRNGKey(0)
    kx, kq, kbq, kk, kbk, kv, kbv, km = jax.random.split(key, 8)

    x = jax.random.normal(kx, (B, S, H), dtype=jnp.float32)

    # Deterministic parameter init (shapes from nn.Linear(hidden, hidden)).
    bound = 1.0 / math.sqrt(H)
    wq = jax.random.uniform(kq, (H, H), minval=-bound, maxval=bound)
    bq = jax.random.uniform(kbq, (H,), minval=-bound, maxval=bound)
    wk = jax.random.uniform(kk, (H, H), minval=-bound, maxval=bound)
    bk = jax.random.uniform(kbk, (H,), minval=-bound, maxval=bound)
    wv = jax.random.uniform(kv, (H, H), minval=-bound, maxval=bound)
    bv = jax.random.uniform(kbv, (H,), minval=-bound, maxval=bound)

    # vocal_mask = randn(1,1,num_bins)*0.1, then bins 1..80 (< num_bins) -> 1.0
    vocal_mask = jax.random.normal(km, (1, 1, NUM_BINS)) * 0.1
    vocal_range_bins = list(range(1, 81))
    idx = jnp.array([b for b in vocal_range_bins if b < NUM_BINS], dtype=jnp.int32)
    vocal_mask = vocal_mask.at[0, 0, idx].set(1.0)

    out = vocal_attention(x, wq, bq, wk, bk, wv, bv, vocal_mask)
    out = jax.block_until_ready(out)

    ref = reference(x, wq, bq, wk, bk, wv, bv, vocal_mask)
    assert out.shape == (B, S, H)
    # Tolerance relaxed for pl.reciprocal(approx=True) in the softmax
    # denominator (EUP vrcp, ~1e-4-class relative error).
    assert jnp.allclose(out, ref, atol=2e-3, rtol=2e-3), (
        f"max abs err = {jnp.max(jnp.abs(out - ref))}")

    print("KERNEL_OK")
</pallas_src>

<mosaic_0001>
module attributes {stable_mosaic.version = 11 : i64} {
  func.func @vocal_attention_kernel(%arg0: memref<16x32xf32, #tpu.memory_space<vmem>>, %arg1: memref<32x384xf32, #tpu.memory_space<vmem>>, %arg2: memref<1x384xf32, #tpu.memory_space<vmem>>, %arg3: memref<16x32xf32, #tpu.memory_space<vmem>>) attributes {dimension_semantics = [], scalar_prefetch = 0 : i64, scratch_operands = 0 : i64, tpu.core_type = #tpu.core_type<tc>} {
    %c0 = arith.constant 0 : index
    %c0_0 = arith.constant 0 : index
    %0 = vector.load %arg0[%c0, %c0_0] : memref<16x32xf32, #tpu.memory_space<vmem>>, vector<16x32xf32>
    %c0_1 = arith.constant 0 : index
    %c0_2 = arith.constant 0 : index
    %1 = vector.load %arg1[%c0_1, %c0_2] : memref<32x384xf32, #tpu.memory_space<vmem>>, vector<32x384xf32>
    %cst = arith.constant dense<0.000000e+00> : vector<16x384xf32>
    %2 = tpu.matmul %0, %1, %cst {dimension_numbers = #tpu.dot_dimension_numbers<[1], [0], [0], [1], [0, 0, 1, 1], [], []>} : vector<16x32xf32>, vector<32x384xf32>, vector<16x384xf32> -> vector<16x384xf32>
    %c0_3 = arith.constant 0 : index
    %c0_4 = arith.constant 0 : index
    %3 = vector.load %arg2[%c0_3, %c0_4] : memref<1x384xf32, #tpu.memory_space<vmem>>, vector<1x384xf32>
    %4 = vector.broadcast %3 : vector<1x384xf32> to vector<16x384xf32>
    %5 = arith.addf %2, %4 : vector<16x384xf32>
    %6 = vector.extract_strided_slice %5 {offsets = [0, 0], sizes = [16, 128], strides = [1, 1]} : vector<16x384xf32> to vector<16x128xf32>
    %7 = vector.extract_strided_slice %5 {offsets = [0, 128], sizes = [16, 128], strides = [1, 1]} : vector<16x384xf32> to vector<16x128xf32>
    %8 = vector.extract_strided_slice %5 {offsets = [0, 256], sizes = [16, 128], strides = [1, 1]} : vector<16x384xf32> to vector<16x128xf32>
    %9 = vector.extract_strided_slice %6 {offsets = [0, 0], sizes = [8, 128], strides = [1, 1]} : vector<16x128xf32> to vector<8x128xf32>
    %10 = vector.extract_strided_slice %7 {offsets = [0, 0], sizes = [8, 128], strides = [1, 1]} : vector<16x128xf32> to vector<8x128xf32>
    %11 = vector.extract_strided_slice %8 {offsets = [0, 0], sizes = [8, 128], strides = [1, 1]} : vector<16x128xf32> to vector<8x128xf32>
    %cst_5 = arith.constant dense<0.000000e+00> : vector<8x8xf32>
    %12 = tpu.matmul %9, %10, %cst_5 {dimension_numbers = #tpu.dot_dimension_numbers<[1], [1], [0], [0], [0, 0, 1, 0], [], []>} : vector<8x128xf32>, vector<8x128xf32>, vector<8x8xf32> -> vector<8x8xf32>
    %cst_6 = arith.constant dense<0xFF800000> : vector<8xf32>
    %13 = vector.multi_reduction <maximumf>, %12, %cst_6 [1] : vector<8x8xf32> to vector<8xf32>
    %14 = vector.shape_cast %13 : vector<8xf32> to vector<8x1xf32>
    %15 = vector.broadcast %14 : vector<8x1xf32> to vector<8x8xf32>
    %16 = arith.subf %12, %15 : vector<8x8xf32>
    %17 = math.exp %16 : vector<8x8xf32>
    %cst_7 = arith.constant dense<0.000000e+00> : vector<8xf32>
    %18 = vector.multi_reduction <add>, %17, %cst_7 [1] : vector<8x8xf32> to vector<8xf32>
    %19 = vector.shape_cast %18 : vector<8xf32> to vector<8x1xf32>
    %20 = tpu.reciprocal %19 {approx = true} : vector<8x1xf32> -> vector<8x1xf32>
    %21 = vector.broadcast %20 : vector<8x1xf32> to vector<8x8xf32>
    %22 = arith.mulf %17, %21 : vector<8x8xf32>
    %cst_8 = arith.constant dense<0.000000e+00> : vector<8x128xf32>
    %23 = tpu.matmul %22, %11, %cst_8 {dimension_numbers = #tpu.dot_dimension_numbers<[1], [0], [0], [1], [0, 0, 1, 1], [], []>} : vector<8x8xf32>, vector<8x128xf32>, vector<8x128xf32> -> vector<8x128xf32>
    %24 = vector.extract_strided_slice %6 {offsets = [8, 0], sizes = [8, 128], strides = [1, 1]} : vector<16x128xf32> to vector<8x128xf32>
    %25 = vector.extract_strided_slice %7 {offsets = [8, 0], sizes = [8, 128], strides = [1, 1]} : vector<16x128xf32> to vector<8x128xf32>
    %26 = vector.extract_strided_slice %8 {offsets = [8, 0], sizes = [8, 128], strides = [1, 1]} : vector<16x128xf32> to vector<8x128xf32>
    %cst_9 = arith.constant dense<0.000000e+00> : vector<8x8xf32>
    %27 = tpu.matmul %24, %25, %cst_9 {dimension_numbers = #tpu.dot_dimension_numbers<[1], [1], [0], [0], [0, 0, 1, 0], [], []>} : vector<8x128xf32>, vector<8x128xf32>, vector<8x8xf32> -> vector<8x8xf32>
    %cst_10 = arith.constant dense<0xFF800000> : vector<8xf32>
    %28 = vector.multi_reduction <maximumf>, %27, %cst_10 [1] : vector<8x8xf32> to vector<8xf32>
    %29 = vector.shape_cast %28 : vector<8xf32> to vector<8x1xf32>
    %30 = vector.broadcast %29 : vector<8x1xf32> to vector<8x8xf32>
    %31 = arith.subf %27, %30 : vector<8x8xf32>
    %32 = math.exp %31 : vector<8x8xf32>
    %cst_11 = arith.constant dense<0.000000e+00> : vector<8xf32>
    %33 = vector.multi_reduction <add>, %32, %cst_11 [1] : vector<8x8xf32> to vector<8xf32>
    %34 = vector.shape_cast %33 : vector<8xf32> to vector<8x1xf32>
    %35 = tpu.reciprocal %34 {approx = true} : vector<8x1xf32> -> vector<8x1xf32>
    %36 = vector.broadcast %35 : vector<8x1xf32> to vector<8x8xf32>
    %37 = arith.mulf %32, %36 : vector<8x8xf32>
    %cst_12 = arith.constant dense<0.000000e+00> : vector<8x128xf32>
    %38 = tpu.matmul %37, %26, %cst_12 {dimension_numbers = #tpu.dot_dimension_numbers<[1], [0], [0], [1], [0, 0, 1, 1], [], []>} : vector<8x8xf32>, vector<8x128xf32>, vector<8x128xf32> -> vector<8x128xf32>
    %39 = tpu.concatenate %23, %38 in 0 : vector<8x128xf32>, vector<8x128xf32> -> vector<16x128xf32>
    %40 = vector.extract_strided_slice %39 {offsets = [0, 0], sizes = [16, 32], strides = [1, 1]} : vector<16x128xf32> to vector<16x32xf32>
    %c0_13 = arith.constant 0 : index
    %c0_14 = arith.constant 0 : index
    %41 = vector.load %arg3[%c0_13, %c0_14] : memref<16x32xf32, #tpu.memory_space<vmem>>, vector<16x32xf32>
    tpu.vector_store %arg3[%c0_13, %c0_14], %40 {strides = array<i32>} : memref<16x32xf32, #tpu.memory_space<vmem>>, vector<16x32xf32>,
    return
  }
}

</mosaic_0001>

<bundles_post_ra>
// kernel: tpu_custom_call.1
= control target key start
LH: loop header
LB: loop body
LE: loop exit
PB: predicated region body
PF: predicated region fallthrough
CT: control target
= control target key end

     0   :  { %8 = vsyncpa [#allocation3], 0  ;;  %s769_s0 = inlined_call_operand.hbm [shape: f32[16,32], index: 0, kind: input, shape index: {}]   ;;  %s770_s1 = inlined_call_operand.hbm [shape: f32[32,384], index: 1, kind: input, shape index: {}]   ;;  %s771_s2 = inlined_call_operand.vmem [shape: f32[1,384], index: 2, kind: input, shape index: {}]   ;;  %s772_s3 = inlined_call_operand.hbm [shape: f32[16,32], index: 3, kind: output, shape index: {}]  }
   0x1   :  { %9 = vsyncpa [#allocation6], 0 }
   0x2   :  { %10 = vsyncpa [#allocation4], 0  ;;  %s696_s12 = smov [#allocation2]  }
   0x3   :  { %s16_s13 = sshll.u32 %s696_s12, 4  ;;  %s17_s13 = int_to_ptr.vmem [resolvable:$true] %s16_s13 }
   0x4   :  { %s638_s14 = scalar_lea.vmem %s17_s13, 256  ;;  %p643_p1 = scmp.lt.s32.totalorder %s17_s13, %s17_s13 }
   0x5   :  { %p639_p0 = scmp.ne.s32.totalorder %s17_s13, %s638_s14  ;;  %p644_p2 = scmp.lt.s32.totalorder %s638_s14, %s638_s14 }
   0x7   :  { %p645_p3 = por %p644_p2, %p643_p1 }
   0x9   :  { %p646_p4 = pnand %p645_p3, %p639_p0 }
   0xb   :  { %649 = shalt.err (!%p646_p4)
}
   0xc   :  { %s697_s15 = smov 128   ;;  %s698_s16 = smov 8  }
   0xd   :  { %22 = dma.hbm_to_vmem [thread:$0]  %s769_s0, 256, %s17_s13, [#allocation3], %s697_s15, %s697_s15, %s698_s16  }
   0xe   :  { %s699_s19 = smov [#allocation5]  }
   0xf   :  { %s28_s20 = sshll.u32 %s699_s19, 4  ;;  %s29_s20 = int_to_ptr.vmem [resolvable:$true] %s28_s20 }
  0x10   :  { %s658_s21 = scalar_lea.vmem %s29_s20, 1536  ;;  %p663_p6 = scmp.lt.s32.totalorder %s29_s20, %s29_s20 }
  0x11   :  { %p659_p5 = scmp.ne.s32.totalorder %s29_s20, %s658_s21  ;;  %p664_p7 = scmp.lt.s32.totalorder %s658_s21, %s658_s21 }
  0x13   :  { %p665_p8 = por %p664_p7, %p663_p6 }
  0x15   :  { %p666_p9 = pnand %p665_p8, %p659_p5 }
  0x17   :  { %669 = shalt.err (!%p666_p9)
}
  0x18   :  { %s700_s22 = smov 384   ;;  %s701_s23 = smov 24  }
  0x19   :  { %34 = dma.hbm_to_vmem [thread:$0]  %s770_s1, 1536, %s29_s20, [#allocation6], %s700_s22, %s700_s22, %s701_s23  }
  0x1a   :  { %690 = dma.done.wait [#allocation3], 256  }
  0x1b   :  { %691 = vsyncadd [#allocation3], 4294967040 }
  0x1c   :  { %692 = dma.done.wait [#allocation6], 1536  }
  0x1d   :  { %693 = vsyncadd [#allocation6], 4294965760  ;;  %v702_v0 = vmov 0.0   ;;  %v55_v1 = vld [vmem:[#allocation5 + $0x50] sm:$0xff]  ;;  %v54_v2 = vld [vmem:[#allocation5 + $0x48] sm:$0xff]  ;;  %vm74_vm0 = vcmask 261120   ;;  %v59_v15 = vlaneseq }
  0x1e   :  { %145 = vmatprep.mubr.f32.mxu0 %v702_v0  ;;  %v52_v3 = vld [vmem:[#allocation5 + $0x38] sm:$0xff]  ;;  %105 = vmatprep.subr.mxu0 %v55_v1  ;;  %v51_v4 = vld [vmem:[#allocation5 + $0x30] sm:$0xff]  ;;  %v49_v5 = vld [vmem:[#allocation5 + $0x20] sm:$0xff]  ;;  %vm703_vm1 = vmmov 0   ;;  %vm303_vm2 = vcmask 64512  }
  0x1f   :  { %106 = vmatpush1.msra.mxu0 %v54_v2  ;;  %v43_v6 = vld [vmem:[#allocation2] sm:$0xff]  ;;  %v48_v7 = vld [vmem:[#allocation5 + $0x18] sm:$0xff]  ;;  %v53_v9 = vld [vmem:[#allocation5 + $0x40] sm:$0xff]  ;;  %v60_v16 = vshrl.u32 %v59_v15, 7 }
  0x20   :  { %107 = vmatprep.subr.mxu0 %v52_v3  ;;  %v56_v8 = vld [vmem:[#allocation5 + $0x58] sm:$0xff]  ;;  %590 = vmatprep.mubr.msk.f32.mxu1 %vm74_vm0, %v43_v6  ;;  %v46_v10 = vld [vmem:[#allocation5 + $0x8] sm:$0xff]  ;;  %v45_v11 = vld [vmem:[#allocation5] sm:$0xff] }
  0x21   :  { %108 = vmatpush1.msra.mxu0 %v51_v4  ;;  %582 = vmatprep.subr.mxu1 %v56_v8  ;;  %v50_v12 = vld [vmem:[#allocation5 + $0x28] sm:$0xff]  ;;  %v44_v13 = vld [vmem:[#allocation2 + $0x8] sm:$0xff]  ;;  %v47_v14 = vld [vmem:[#allocation5 + $0x10] sm:$0xff]  ;;  %v65_v17 = vsub.s32 1, %v60_v16  ;;  %v61_v19 = vsub.s32 0, %v60_v16  ;;  %v69_v30 = vsub.s32 2, %v60_v16 }
  0x22   :  { %109 = vmatprep.subr.mxu0 %v49_v5  ;;  %583 = vmatpush3.msra.mxu1 %v56_v8  ;;  %v57_v18 = vld [vmem:[%s771_s2] sm:$0x7]  ;;  %s704_s2 = smov [#allocation7]  }
  0x23   :  { %110 = vmatpush1.msra.mxu0 %v48_v7  ;;  %584 = vmatprep.subr.mxu1 %v53_v9  ;;  %v66_v20 = vrot.slane %v57_v18, %v65_v17  ;;  %v62_v22 = vrot.slane %v57_v18, %v61_v19  ;;  %v70_v31 = vrot.slane %v57_v18, %v69_v30  ;;  %s549_s26 = sshll.u32 %s704_s2, 4  ;;  %s550_s26 = int_to_ptr.vmem [resolvable:$true] %s549_s26 }
  0x24   :  { %111 = vmatprep.subr.mxu0 %v46_v10  ;;  %585 = vmatpush3.msra.mxu1 %v53_v9  ;;  %s670_s27 = scalar_lea.vmem %s550_s26, 256  ;;  %p675_p11 = scmp.lt.s32.totalorder %s550_s26, %s550_s26 }
  0x25   :  { %112 = vmatpush1.msra.mxu0 %v45_v11  ;;  %586 = vmatprep.subr.mxu1 %v50_v12  ;;  %p671_p10 = scmp.ne.s32.totalorder %s550_s26, %s670_s27  ;;  %p676_p12 = scmp.lt.s32.totalorder %s670_s27, %s670_s27 }
  0x26   :  { %562 = vmatmul.mubr.msk.f32.vlgmr.msra.gmra.mxu0 %vm74_vm0, %v43_v6  ;;  %587 = vmatpush3.msra.mxu1 %v50_v12 }
  0x27   :  { %151 = vmatprep.mubr.f32.mxu0 %v702_v0  ;;  %598 = vmatprep.subr.mxu0 %v702_v0  ;;  %p677_p13 = por %p676_p12, %p675_p11 }
  0x28   :  { %588 = vmatprep.subr.mxu1 %v47_v14 }
  0x29   :  { %589 = vmatpush3.msra.mxu1 %v47_v14  ;;  %p678_p0 = pnand %p677_p13, %p671_p10 }
  0x2a   :  { %563 = vmatmul.mubr.msk.f32.gmra.mxu0 %vm74_vm0, %v44_v13  ;;  %591 = vmatmul.mubr.msk.f32.vlgmr.msra.gmra.mxu1 %vm74_vm0, %v44_v13 }
  0x2b   :  { %593 = vmatprep.subr.mxu1 %v702_v0  ;;  %595 = vmatprep.mubr.msk.f32.mxu1 %vm703_vm1, %v702_v0 }
  0x2c   :  { %600 = vmatprep.mubr.msk.f32.mxu0 %vm703_vm1, %v702_v0 }
  0xe6   :  { %v147_v21 = vpop.f32.mrf.mxu0 }
  0xe7   :  { %v148_v26 = vadd.f32 %v147_v21, %v62_v22 }
  0xe8   :  { %v149_v23 = vpop.f32.mrf.mxu0 }
  0xe9   :  { %v150_v24 = vadd.f32 %v149_v23, %v66_v20 }
  0xea   :  { %v153_v25 = vpop.f32.mrf.mxu0  ;;  %v592_v32 = vpop.f32.mrf.mxu1 }
  0xeb   :  { %594 = vmatpush3.xpose.msra.mxu1 %v150_v24  ;;  %v154_v29 = vadd.f32 %v153_v25, %v62_v22  ;;  %v230_v33 = vadd.f32 %v592_v32, %v70_v31 }
  0xec   :  { %v155_v27 = vpop.f32.mrf.mxu0  ;;  %603 = vmatprep.subr.mxu1 %v702_v0  ;;  %v224_v34 = vpop.f32.mrf.mxu1 }
  0xed   :  { %v156_v28 = vadd.f32 %v155_v27, %v66_v20  ;;  %v225_v35 = vadd.f32 %v224_v34, %v70_v31 }
  0xee   :  { %596 = vmatmul.mubr.f32.vlgmr.msra.gmra.mxu1 %v148_v26 }
  0xef   :  { %604 = vmatpush3.xpose.msra.mxu1 %v156_v28  ;;  %605 = vmatprep.mubr.msk.f32.mxu1 %vm703_vm1, %v702_v0 }
  0xf0   :  { %599 = vmatpush3.msra.mxu0 %v225_v35 }
  0xf1   :  { %608 = vmatprep.subr.mxu0 %v702_v0 }
  0xf2   :  { %606 = vmatmul.mubr.f32.vlgmr.msra.gmra.mxu1 %v154_v29 }
 0x1ae   :  { %v299_v36 = vpop.f32.mrf.mxu1 }
 0x1af   :  { %v304_v37 = vsel %vm303_vm2, %v299_v36, -inf }
 0x1b0   :  { %305 = vmax.xlane.f32.xlu0 %v304_v37  ;;  %v597_v38 = vpop.f32.mrf.mxu1 }
 0x1b2   :  { %v454_v39 = vpop.f32.mrf.mxu1 }
 0x1b3   :  { %v458_v40 = vsel %vm303_vm2, %v454_v39, -inf }
 0x1b4   :  { %459 = vmax.xlane.f32.xlu0 %v458_v40  ;;  %v607_v41 = vpop.f32.mrf.mxu1 }
 0x239   :  { %v306_v42 = vpop.xlane.xlu0 %305 }
 0x23a   :  { %v307_v43 = vsub.f32 %v299_v36, %v306_v42 }
 0x23c   :  { %v308_v44 = vmul.f32 1.442695, %v307_v43 }
 0x23d   :  { %v460_v45 = vpop.xlane.xlu0 %459 }
 0x23e   :  { %622 = vpow2.f32 %v308_v44  ;;  %v461_v46 = vsub.f32 %v454_v39, %v460_v45 }
 0x240   :  { %v462_v47 = vmul.f32 1.442695, %v461_v46 }
 0x242   :  { %624 = vpow2.f32 %v462_v47 }
 0x24b   :  { %v623_v48 = vpop.eup %622 }
 0x24c   :  { %v310_v49 = vsel %vm303_vm2, %v623_v48, 0.0 }
 0x24d   :  { %311 = vadd.xlane.f32.xlu1 %v310_v49 }
 0x24f   :  { %v625_v50 = vpop.eup %624 }
 0x250   :  { %v464_v51 = vsel %vm303_vm2, %v625_v50, 0.0 }
 0x251   :  { %465 = vadd.xlane.f32.xlu1 %v464_v51 }
 0x2d6   :  { %v312_v52 = vpop.xlane.xlu1 %311 }
 0x2d7   :  { %626 = vrcp.f32 %v312_v52 }
 0x2da   :  { %v466_v53 = vpop.xlane.xlu1 %465 }
 0x2db   :  { %628 = vrcp.f32 %v466_v53 }
 0x2e4   :  { %v627_v54 = vpop.eup %626 }
 0x2e5   :  { %v314_v55 = vmul.f32 %v627_v54, %v623_v48 }
 0x2e7   :  { %601 = vmatmul.mubr.msk.f32.vlgmr.msra.gmra.mxu0 %vm303_vm2, %v314_v55 }
 0x2e8   :  { %v629_v56 = vpop.eup %628  ;;  %609 = vmatpush3.msra.mxu0 %v230_v33  ;;  %610 = vmatprep.mubr.msk.f32.mxu0 %vm703_vm1, %v702_v0 }
 0x2e9   :  { %v468_v57 = vmul.f32 %v629_v56, %v625_v50 }
 0x2eb   :  { %611 = vmatmul.mubr.msk.f32.vlgmr.msra.gmra.mxu0 %vm303_vm2, %v468_v57 }
 0x3a7   :  { %v384_v58 = vpop.f32.mrf.mxu0 }
 0x3a8   :  { %542 = vst.msk [vmem:[#allocation7] sm:$0xff] %vm74_vm0, %v384_v58 }
 0x3a9   :  { %v602_v59 = vpop.f32.mrf.mxu0 }
 0x3ab   :  { %v538_v60 = vpop.f32.mrf.mxu0 }
 0x3ac   :  { %543 = vst.msk [vmem:[#allocation7 + $0x8] sm:$0xff] %vm74_vm0, %v538_v60 }
 0x3ad   :  { %v612_v61 = vpop.f32.mrf.mxu0 }
 0x3ae   :  { %681 = shalt.err (!%p678_p0)
}
 0x3af   :  { %555 = dma.vmem_to_hbm [thread:$0]  %s550_s26, 256, %s772_s3, [#allocation4], %s697_s15, %s697_s15, %s698_s16  }
 0x3b0   :  { %694 = dma.done.wait [#allocation4], 256  }
 0x3b1   :  { %695 = vsyncadd [#allocation4], 4294967040 }
 0x3b2   :  { %559 = vsyncpa [#allocation3], 1 }
 0x3b3   :  { %560 = vsyncpa [#allocation6], 1 }
 0x3b4   :  { %561 = vsyncpa [#allocation4], 1 }

</bundles_post_ra>
